<compile_context>
chip_gen: v7x
topology: tpu7x:2x2x1
jax: 0.10.0
libtpu: 0.0.40
codegen_flags: <defaults>
</compile_context>

<pallas_src>
import functools

import jax
import jax.numpy as jnp
from jax.experimental import pallas as pl
from jax.experimental.pallas import tpu as pltpu


def _round_up(a: int, m: int) -> int:
    return ((a + m - 1) // m) * m


def _pick_tm(T: int, tm_target: int) -> int:
    """Row tile: multiple of 8, large (target 2048), and chosen so the grid has
    at least 2 steps whenever T allows it (both v7x TensorCores get work)."""
    if T < 16:
        return 8
    half = -(-T // 2)
    align = 256 if half >= 256 else 8
    return max(8, min(tm_target, _round_up(half, align)))


# ----------------------------- Pallas kernel ---------------------------------
def _spt_kernel(xw_ref, w_ref, cnt_ref, wsum_ref, b_ref, out_ref, *, inv_patch_dim):
    # xw_ref   : (tm, Kw)     bf16 overlapping-window tokens
    # w_ref    : (Kw, n_pad)  bf16 expanded folded weight (gamma*W scattered onto windows)
    # cnt_ref  : (1, Kw)      f32 multiplicity of each window column in the true token
    # wsum_ref : (1, n_pad)   f32 column sums of w_ref  (= sum_k gamma_k * W[k, :])
    # b_ref    : (1, n_pad)   f32 folded bias (beta @ W + b)
    # out_ref  : (tm, n_pad)  x.dtype
    xw_bf = xw_ref[...]
    xw = xw_bf.astype(jnp.float32)
    cnt = cnt_ref[...]

    # LayerNorm stats of the TRUE patch_dim-element token, computed from the
    # window representation: sum_k tok_k == sum_w cnt_w * xwin_w.
    s1 = jnp.sum(xw * cnt, axis=-1, keepdims=True)
    s2 = jnp.sum(xw * xw * cnt, axis=-1, keepdims=True)
    mean = s1 * inv_patch_dim
    # One-pass variance, clamped: f32 cancellation can make it slightly negative.
    var = jnp.maximum(s2 * inv_patch_dim - mean * mean, 0.0)
    inv = jax.lax.rsqrt(var + jnp.float32(1e-5))

    # Un-normalized matmul + per-row correction:
    #   ((tok - mean) * inv) @ (gamma*W) == inv*(xwin @ Wexp) - inv*mean*colsum(Wexp)
    m = jnp.dot(xw_bf, w_ref[...], preferred_element_type=jnp.float32)
    out = inv * m - (inv * mean) * wsum_ref[...] + b_ref[...]
    out_ref[...] = out.astype(out_ref.dtype)


def _spt_window_matmul(xwin, w_exp, cnt, wsum, b_fold, *, patch_dim, tm, out_dtype):
    """xwin: (T_pad, Kw) bf16 -> (T_pad, n_pad) out_dtype.  T_pad % tm == 0."""
    T_pad, Kw = xwin.shape
    n_pad = w_exp.shape[1]
    assert T_pad % tm == 0

    out_bytes = jnp.dtype(out_dtype).itemsize
    # Double-buffered per-step bytes; at tm=2048, Kw~36, n_pad=128 this is ~3 MiB,
    # far below the v7x 64 MiB VMEM (32 MiB scoped default) even per-core.
    est = (2 * tm * Kw * 2 + 2 * tm * n_pad * out_bytes
           + 2 * Kw * n_pad * 2 + 2 * Kw * 4 + 4 * n_pad * 4)
    vmem_limit = int(min(max(2 * est, 16 * 1024 * 1024), 48 * 1024 * 1024))

    kernel = functools.partial(_spt_kernel, inv_patch_dim=1.0 / patch_dim)
    return pl.pallas_call(
        kernel,
        out_shape=jax.ShapeDtypeStruct((T_pad, n_pad), out_dtype),
        grid_spec=pltpu.PrefetchScalarGridSpec(
            num_scalar_prefetch=0,
            grid=(T_pad // tm,),
            in_specs=[
                pl.BlockSpec((tm, Kw), lambda i: (i, 0)),
                pl.BlockSpec((Kw, n_pad), lambda i: (0, 0)),
                pl.BlockSpec((1, Kw), lambda i: (0, 0)),
                pl.BlockSpec((1, n_pad), lambda i: (0, 0)),
                pl.BlockSpec((1, n_pad), lambda i: (0, 0)),
            ],
            out_specs=pl.BlockSpec((tm, n_pad), lambda i: (i, 0)),
        ),
        compiler_params=pltpu.CompilerParams(
            dimension_semantics=("parallel",),
            vmem_limit_bytes=vmem_limit),
    )(xwin, w_exp, cnt, wsum, b_fold)


# ------------------------- parameter folding (offline) ------------------------
def _fold_and_expand_params(params, *, patch_size, channels):
    """Fold LN affine into the Linear and scatter (gamma*W) rows onto the
    overlapping-window layout.  Returns lane-dense (n_pad) padded params."""
    P, C = patch_size, channels
    C5 = 5 * C
    patch_dim = P * C5
    Kw = (P + 2) * (C + 2)

    gamma = params["gamma"].reshape(-1).astype(jnp.float32)      # (patch_dim,)
    beta = params["beta"].reshape(-1).astype(jnp.float32)
    w = params["w"].astype(jnp.float32)                           # (patch_dim, dim)
    b = params["b"].reshape(-1).astype(jnp.float32)
    dim = w.shape[1]
    n_pad = _round_up(dim, 128)

    wg = gamma[:, None] * w                                       # LN scale folded into W

    # Token index k = j*5C + (g*C + c) (torch Rearrange '(p c)' with channel
    # blocks [x, seq t-1, seq t+1, chan c-1, chan c+1]).  Its value is window
    # element (jj, cc) = (j + dj[g], c + dc[g]) of the (P+2, C+2) zero-haloed
    # window of xpad (halo rows/cols supply the F.pad zeros).
    k = jnp.arange(patch_dim)
    j = k // C5
    rem = k % C5
    g = rem // C
    c = rem % C
    dj = jnp.asarray([1, 0, 2, 1, 1], jnp.int32)
    dc = jnp.asarray([1, 1, 1, 0, 2], jnp.int32)
    wrow = (j + dj[g]) * (C + 2) + (c + dc[g])                    # (patch_dim,)

    w_exp = jnp.zeros((Kw, dim), jnp.float32).at[wrow].add(wg)    # sum_{k->w} gamma_k W_k
    cnt = jnp.zeros((Kw,), jnp.float32).at[wrow].add(1.0)         # window-column multiplicity

    w_exp = w_exp.astype(jnp.bfloat16)
    # colsum(Wexp) == sum_k gamma_k W_k ; computed from the bf16-rounded weight
    # so the mean-correction term is consistent with the matmul path.
    wsum = jnp.sum(w_exp.astype(jnp.float32), axis=0, keepdims=True)
    b_fold = (beta @ w + b).reshape(1, dim)

    w_exp = jnp.pad(w_exp, ((0, 0), (0, n_pad - dim)))
    wsum = jnp.pad(wsum, ((0, 0), (0, n_pad - dim)))
    b_fold = jnp.pad(b_fold, ((0, 0), (0, n_pad - dim)))
    return (w_exp, cnt.reshape(1, Kw), wsum.astype(jnp.float32),
            b_fold.astype(jnp.float32), patch_dim, dim, Kw, n_pad)


# ------------------------------ forward (wrapper) ------------------------------
def spt_forward(x, params, *, patch_size, tm_target=2048):
    """x: (B, C, L) -> (B, n_patches, dim).  Matches torch SPT.forward."""
    B, C, L = x.shape
    P = patch_size
    assert L % P == 0
    n = L // P

    (w_exp, cnt, wsum, b_fold, patch_dim, dim, Kw, n_pad) = _fold_and_expand_params(
        params, patch_size=P, channels=C)

    # Zero-haloed bf16 transpose: xpad[b, t+1, c+1] = x[b, c, t].  The halo
    # rows/cols provide every F.pad zero of the 4 shifts and isolate batches.
    xpad = jnp.pad(jnp.transpose(x, (0, 2, 1)).astype(jnp.bfloat16),
                   ((0, 0), (1, 1), (1, 1)))
    # Overlapping (P+2)-row windows with stride P:
    #   xwin[b, m, jj*(C+2)+cc] = xpad[b, m*P + jj, cc]
    rows = [xpad[:, jj: jj + (n - 1) * P + 1: P, :] for jj in range(P + 2)]
    xwin = jnp.concatenate(rows, axis=-1).reshape(B * n, Kw)

    T = B * n
    tm = _pick_tm(T, tm_target)
    T_pad = _round_up(T, tm)
    xwin = jnp.pad(xwin, ((0, T_pad - T), (0, 0)))

    out = _spt_window_matmul(xwin, w_exp, cnt, wsum, b_fold,
                             patch_dim=patch_dim, tm=tm, out_dtype=x.dtype)
    return out[:T, :dim].reshape(B, n, dim)


# ------------------------------ pure-JAX reference -----------------------------
def _build_shifted(x):
    """x: (B, C, L). Reproduce the 4 F.pad shifts + concat along channels."""
    B, C, L = x.shape
    zeros_seq = jnp.zeros((B, C, 1), x.dtype)
    zeros_ch = jnp.zeros((B, 1, L), x.dtype)
    s1 = jnp.concatenate([zeros_seq, x[:, :, :-1]], axis=2)   # (1,-1,0,0)
    s2 = jnp.concatenate([x[:, :, 1:], zeros_seq], axis=2)    # (-1,1,0,0)
    s3 = jnp.concatenate([zeros_ch, x[:, :-1, :]], axis=1)    # (0,0,1,-1)
    s4 = jnp.concatenate([x[:, 1:, :], zeros_ch], axis=1)     # (0,0,-1,1)
    return jnp.concatenate([x, s1, s2, s3, s4], axis=1)       # (B, 5C, L)


def spt_reference(x, params, *, patch_size):
    """f32 reference matching the torch module exactly."""
    B, C, L = x.shape
    n = L // patch_size
    x5 = _build_shifted(x)
    C5 = 5 * C
    tokens = (x5.reshape(B, C5, n, patch_size)
                .transpose(0, 2, 3, 1)                        # 'b n (p c)'
                .reshape(B, n, patch_size * C5)).astype(jnp.float32)
    mean = jnp.mean(tokens, axis=-1, keepdims=True)
    var = jnp.mean((tokens - mean) ** 2, axis=-1, keepdims=True)
    xn = (tokens - mean) * jax.lax.rsqrt(var + 1e-5)
    xn = xn * params["gamma"][0] + params["beta"][0]
    return xn @ params["w"] + params["b"][0]


# ---------------------------------- main --------------------------------------
if __name__ == "__main__":
    B, C, L = 2, 4, 32          # batch, channels, sequence length
    patch_size = 4
    dim = 32
    patch_dim = patch_size * 5 * C  # 80

    key = jax.random.PRNGKey(0)
    kx, kg, kb, kw, kbias = jax.random.split(key, 5)

    x = jax.random.normal(kx, (B, C, L), dtype=jnp.float32)
    params = {
        "gamma": (1.0 + 0.1 * jax.random.normal(kg, (1, patch_dim))).astype(jnp.float32),
        "beta": (0.1 * jax.random.normal(kb, (1, patch_dim))).astype(jnp.float32),
        # Linear weight stored as (patch_dim, dim) = torch weight.T
        "w": (jax.random.normal(kw, (patch_dim, dim)) / jnp.sqrt(patch_dim)).astype(jnp.float32),
        "b": (0.1 * jax.random.normal(kbias, (1, dim))).astype(jnp.float32),
    }

    fwd = jax.jit(lambda xx, pp: spt_forward(xx, pp, patch_size=patch_size))
    out = jax.block_until_ready(fwd(x, params))
    ref = spt_reference(x, params, patch_size=patch_size)

    assert out.shape == (B, L // patch_size, dim)
    # bf16 token / weight streams into the MXU -> looser tolerance vs f32 ref.
    assert jnp.allclose(out, ref, atol=3e-2, rtol=3e-2), "mismatch vs reference"
    print("KERNEL_OK")
</pallas_src>

<mosaic_0001>
module attributes {stable_mosaic.version = 11 : i64} {
  func.func private @main(%arg0: i32) attributes {dimension_semantics = [#tpu.dimension_semantics<core_parallel>], iteration_bounds = array<i64: 2>, tpu.core_type = #tpu.core_type<sc_scalar_subcore>, window_params = []} {
    return
  }
}

module attributes {stable_mosaic.version = 11 : i64} {
  func.func private @main(%arg0: i32) attributes {dimension_semantics = [#tpu.dimension_semantics<core_parallel>], iteration_bounds = array<i64: 2>, tpu.core_type = #tpu.core_type<sc_scalar_subcore>, window_params = []} {
    return
  }
}

module attributes {stable_mosaic.version = 11 : i64} {
  func.func @_spt_kernel(%arg0: i32, %arg1: memref<8x36xbf16, #tpu.memory_space<vmem>>, %arg2: memref<36x128xbf16, #tpu.memory_space<vmem>>, %arg3: memref<1x36xf32, #tpu.memory_space<vmem>>, %arg4: memref<1x128xf32, #tpu.memory_space<vmem>>, %arg5: memref<1x128xf32, #tpu.memory_space<vmem>>, %arg6: memref<8x128xf32, #tpu.memory_space<vmem>>) attributes {dimension_semantics = [#tpu.dimension_semantics<parallel>], iteration_bounds = array<i64: 2>, scalar_prefetch = 0 : i64, scratch_operands = 0 : i64, tpu.core_type = #tpu.core_type<tc>, window_params = [{transform_indices = @transform_0, window_bounds = array<i64: 8, 36>}, {pipeline_mode = #tpu.pipeline_mode<synchronous>, transform_indices = @transform_1, window_bounds = array<i64: 36, 128>}, {pipeline_mode = #tpu.pipeline_mode<synchronous>, transform_indices = @transform_2, window_bounds = array<i64: 1, 36>}, {pipeline_mode = #tpu.pipeline_mode<synchronous>, transform_indices = @transform_3, window_bounds = array<i64: 1, 128>}, {pipeline_mode = #tpu.pipeline_mode<synchronous>, transform_indices = @transform_4, window_bounds = array<i64: 1, 128>}, {transform_indices = @transform_5, window_bounds = array<i64: 8, 128>}]} {
    %c0 = arith.constant 0 : index
    %c0_0 = arith.constant 0 : index
    %0 = vector.load %arg1[%c0, %c0_0] : memref<8x36xbf16, #tpu.memory_space<vmem>>, vector<8x36xbf16>
    %1 = arith.extf %0 : vector<8x36xbf16> to vector<8x36xf32>
    %c0_1 = arith.constant 0 : index
    %c0_2 = arith.constant 0 : index
    %2 = vector.load %arg3[%c0_1, %c0_2] : memref<1x36xf32, #tpu.memory_space<vmem>>, vector<1x36xf32>
    %3 = vector.broadcast %2 : vector<1x36xf32> to vector<8x36xf32>
    %4 = arith.mulf %1, %3 : vector<8x36xf32>
    %cst = arith.constant dense<0.000000e+00> : vector<8xf32>
    %5 = vector.multi_reduction <add>, %4, %cst [1] : vector<8x36xf32> to vector<8xf32>
    %6 = vector.shape_cast %5 : vector<8xf32> to vector<8x1xf32>
    %7 = arith.mulf %1, %1 : vector<8x36xf32>
    %8 = vector.broadcast %2 : vector<1x36xf32> to vector<8x36xf32>
    %9 = arith.mulf %7, %8 : vector<8x36xf32>
    %cst_3 = arith.constant dense<0.000000e+00> : vector<8xf32>
    %10 = vector.multi_reduction <add>, %9, %cst_3 [1] : vector<8x36xf32> to vector<8xf32>
    %11 = vector.shape_cast %10 : vector<8xf32> to vector<8x1xf32>
    %cst_4 = arith.constant 1.250000e-02 : f32
    %12 = vector.broadcast %cst_4 : f32 to vector<8x1xf32>
    %13 = arith.mulf %6, %12 : vector<8x1xf32>
    %cst_5 = arith.constant 1.250000e-02 : f32
    %14 = vector.broadcast %cst_5 : f32 to vector<8x1xf32>
    %15 = arith.mulf %11, %14 : vector<8x1xf32>
    %16 = arith.mulf %13, %13 : vector<8x1xf32>
    %17 = arith.subf %15, %16 : vector<8x1xf32>
    %cst_6 = arith.constant 0.000000e+00 : f32
    %18 = vector.broadcast %cst_6 : f32 to vector<8x1xf32>
    %19 = arith.maximumf %17, %18 : vector<8x1xf32>
    %cst_7 = arith.constant 9.99999974E-6 : f32
    %20 = vector.broadcast %cst_7 : f32 to vector<8x1xf32>
    %21 = arith.addf %19, %20 : vector<8x1xf32>
    %22 = math.rsqrt %21 : vector<8x1xf32>
    %c0_8 = arith.constant 0 : index
    %c0_9 = arith.constant 0 : index
    %23 = vector.load %arg2[%c0_8, %c0_9] : memref<36x128xbf16, #tpu.memory_space<vmem>>, vector<36x128xbf16>
    %cst_10 = arith.constant dense<0.000000e+00> : vector<8x128xf32>
    %24 = tpu.matmul %0, %23, %cst_10 {dimension_numbers = #tpu.dot_dimension_numbers<[1], [0], [0], [1], [0, 0, 1, 1], [], []>} : vector<8x36xbf16>, vector<36x128xbf16>, vector<8x128xf32> -> vector<8x128xf32>
    %25 = vector.broadcast %22 : vector<8x1xf32> to vector<8x128xf32>
    %26 = arith.mulf %25, %24 : vector<8x128xf32>
    %27 = arith.mulf %22, %13 : vector<8x1xf32>
    %c0_11 = arith.constant 0 : index
    %c0_12 = arith.constant 0 : index
    %28 = vector.load %arg4[%c0_11, %c0_12] : memref<1x128xf32, #tpu.memory_space<vmem>>, vector<1x128xf32>
    %29 = vector.broadcast %27 : vector<8x1xf32> to vector<8x128xf32>
    %30 = vector.broadcast %28 : vector<1x128xf32> to vector<8x128xf32>
    %31 = arith.mulf %29, %30 : vector<8x128xf32>
    %32 = arith.subf %26, %31 : vector<8x128xf32>
    %c0_13 = arith.constant 0 : index
    %c0_14 = arith.constant 0 : index
    %33 = vector.load %arg5[%c0_13, %c0_14] : memref<1x128xf32, #tpu.memory_space<vmem>>, vector<1x128xf32>
    %34 = vector.broadcast %33 : vector<1x128xf32> to vector<8x128xf32>
    %35 = arith.addf %32, %34 : vector<8x128xf32>
    %c0_15 = arith.constant 0 : index
    %c0_16 = arith.constant 0 : index
    %36 = vector.load %arg6[%c0_15, %c0_16] : memref<8x128xf32, #tpu.memory_space<vmem>>, vector<8x128xf32>
    tpu.vector_store %arg6[%c0_15, %c0_16], %35 {strides = array<i32>} : memref<8x128xf32, #tpu.memory_space<vmem>>, vector<8x128xf32>,
    return
  }
  func.func @transform_0(%arg0: i32) -> (i32, i32) {
    %c0_i32 = arith.constant 0 : i32
    %c0_i32_0 = arith.constant 0 : i32
    return %arg0, %c0_i32 : i32, i32
  }
  func.func @transform_1(%arg0: i32) -> (i32, i32) {
    %c0_i32 = arith.constant 0 : i32
    %c0_i32_0 = arith.constant 0 : i32
    %c0_i32_1 = arith.constant 0 : i32
    return %c0_i32, %c0_i32_0 : i32, i32
  }
  func.func @transform_2(%arg0: i32) -> (i32, i32) {
    %c0_i32 = arith.constant 0 : i32
    %c0_i32_0 = arith.constant 0 : i32
    %c0_i32_1 = arith.constant 0 : i32
    return %c0_i32, %c0_i32_0 : i32, i32
  }
  func.func @transform_3(%arg0: i32) -> (i32, i32) {
    %c0_i32 = arith.constant 0 : i32
    %c0_i32_0 = arith.constant 0 : i32
    %c0_i32_1 = arith.constant 0 : i32
    return %c0_i32, %c0_i32_0 : i32, i32
  }
  func.func @transform_4(%arg0: i32) -> (i32, i32) {
    %c0_i32 = arith.constant 0 : i32
    %c0_i32_0 = arith.constant 0 : i32
    %c0_i32_1 = arith.constant 0 : i32
    return %c0_i32, %c0_i32_0 : i32, i32
  }
  func.func @transform_5(%arg0: i32) -> (i32, i32) {
    %c0_i32 = arith.constant 0 : i32
    %c0_i32_0 = arith.constant 0 : i32
    return %arg0, %c0_i32 : i32, i32
  }
}

</mosaic_0001>

<bundles_post_ra>
// kernel: _lambda_.1
= control target key start
LH: loop header
LB: loop body
LE: loop exit
PB: predicated region body
PF: predicated region fallthrough
CT: control target
= control target key end

     0   :  { %s472_s18 = smov 0   ;;  %s511_s0 = inlined_call_operand.vmem [shape: bf16[16,36], index: 0, kind: input, shape index: {}]   ;;  %s512_s1 = inlined_call_operand.vmem [shape: bf16[36,128], index: 1, kind: input, shape index: {}]   ;;  %s513_s2 = inlined_call_operand.vmem [shape: f32[1,36], index: 2, kind: input, shape index: {}]   ;;  %s514_s3 = inlined_call_operand.vmem [shape: f32[1,128], index: 3, kind: input, shape index: {}]   ;;  %s515_s4 = inlined_call_operand.vmem [shape: f32[1,128], index: 4, kind: input, shape index: {}]   ;;  %s516_s5 = inlined_call_operand.vmem [shape: f32[16,128], index: 5, kind: output, shape index: {}]  }
   0x1 LB: > { %s387_s19 = sadd.s32 4294967295, %s438_s18   ;;  %p391_p0 = scmp.ge.s32.totalorder %s438_s18, 1  ;;  %s438_s18 = sphi %s472_s18, %s15_s18  }
   0x2   : > { %p186_p1 = scmp.lt.s32.totalorder %s438_s18, 3 }
   0x4   : > { %p187_p2 = pnand %p391_p0, %p186_p1 }
   0x5   : > { %v427_v0 = vld [vmem:[%s512_s1] sm:$0xff] (!%p187_p2)   ;;  %v440_v1 = vmov (!%p187_p2), 0.0   ;;  %v428_v2 = vld [vmem:[%s512_s1 + $0x8] sm:$0xff] (!%p187_p2)   ;;  %v429_v3 = vld [vmem:[%s512_s1 + $0x10] ss:$0 sps:$4 sm:$0x33] (!%p187_p2)  }
   0x6   : > { %190 = sbr.rel (%p187_p2) target bundleno = 237 (0xed), region = 40  ;;  %407 = vmatprep.subr.bf16.mxu0 (!%p187_p2), %v440_v1  ;;  %vm441_vm0 = vmmov (!%p187_p2), 0   ;;  %p212_p3 = scmp.lt.s32.totalorder (!%p187_p2), %s387_s19, 1  ;;  %vm270_vm1 = vcmask (!%p187_p2), 1041408   ;;  %v394_v6 = vld [vmem:[%s513_s2] ss:$0 sm:$0xff] (!%p187_p2) }
   0x7   : > { %408 = vmatpush3.bf16.msra.mxu0 (!%p187_p2), %v427_v0  ;;  %413 = vmatprep.mubr.msk.bf16.mxu0 (!%p187_p2), %vm441_vm0, %v440_v1  ;;  %v272_v4 = vsel (!%p187_p2), %vm270_vm1, %v429_v3, 0  ;;  %vm231_vm2 = vcmask (!%p187_p2), 293888   ;;  %v399_v23 = vld [vmem:[%s514_s3] ss:$0 sm:$0xff] (!%p187_p2) }
   0x8   : > { %409 = vmatprep.subr.bf16.mxu0 (!%p187_p2), %v440_v1  ;;  %v400_v28 = vld [vmem:[%s515_s4] ss:$0 sm:$0xff] (!%p187_p2) }
   0xb   : > { %410 = vmatpush3.bf16.msra.mxu0 (!%p187_p2), %v428_v2 }
   0xc   : > { %411 = vmatprep.subr.bf16.mxu0 (!%p187_p2), %v440_v1 }
   0xd   : > { %s518_s19 = smov (!%p212_p3, %s387_s19), 1 }
   0xe   : > { %s392_s26 = sshll.u32 %s518_s19, 2  ;;  %s393_s9 = sshll.u32 %s518_s19, 3 }
   0xf   : > { %s215_s29 = scalar_lea.vmem %s511_s0, %s392_s26  ;;  %412 = vmatpush3.bf16.msra.mxu0 %v272_v4  ;;  %s219_s14 = scalar_lea.vmem %s516_s5, %s393_s9 }
  0x10   : > { %v221_v5 = vld [vmem:[%s215_s29] sm:$0xf] }
  0x11   : > { %v222_v7 = vunpack.c.l.bf16 %v221_v5 }
  0x12   : > { %414 = vmatmul.mubr.msk.bf16.vlgmr.msra.gmra.mrb[0].mxu0 %vm231_vm2, %v221_v5 }
  0x13   : > { %v230_v8 = vmul.f32 %v394_v6, %v222_v7  ;;  %v235_v9 = vmul.f32 %v222_v7, %v222_v7 }
  0x15   : > { %v232_v10 = vsel %vm231_vm2, %v230_v8, 0.0  ;;  %v236_v11 = vmul.f32 %v394_v6, %v235_v9 }
  0x16   : > { %233 = vadd.xlane.f32.xlu0 %v232_v10 }
  0x17   : > { %v237_v12 = vsel %vm231_vm2, %v236_v11, 0.0 }
  0x1a   : > { %238 = vadd.xlane.f32.xlu0 %v237_v12 }
  0xa3   : > { %v234_v13 = vpop.xlane.xlu0 %233 }
  0xa4   : > { %v240_v14 = vmul.f32 0.0125, %v234_v13 }
  0xa6   : > { %v242_v16 = vmul.f32 %v240_v14, %v240_v14 }
  0xa7   : > { %v239_v15 = vpop.xlane.xlu0 %238 }
  0xa8   : > { %v241_v17 = vmul.f32 0.0125, %v239_v15 }
  0xaa   : > { %v243_v18 = vsub.f32 %v241_v17, %v242_v16 }
  0xac   : > { %v244_v19 = vmax.f32 %v243_v18, 0.0 }
  0xae   : > { %v245_v20 = vadd.f32 1e-05, %v244_v19 }
  0xb0   : > { %430 = vrsqrt.f32 %v245_v20 }
  0xba   : > { %v431_v21 = vpop.eup %430 }
  0xbb   : > { %v315_v22 = vmul.f32 %v431_v21, %v240_v14 }
  0xbd   : > { %v323_v26 = vmul.f32 %v399_v23, %v315_v22 }
  0xe5   : > { %v308_v24 = vpop.f32.mrb[0].mxu0 }
  0xe6   : > { %v314_v25 = vmul.f32 %v431_v21, %v308_v24  ;;  %v415_v27 = vpop.f32.mrb[1].mxu0 }
  0xe7   : > { %v311_v29 = vpop.f32.mrb[2].mxu0 }
  0xe8   : > { %v324_v30 = vsub.f32 %v314_v25, %v323_v26  ;;  %v416_v31 = vpop.f32.mrb[3].mxu0 }
  0xea   : > { %v332_v32 = vadd.f32 %v400_v28, %v324_v30 }
  0xec   : > { %333 = vst [vmem:[%s219_s14] sm:$0xff] %v332_v32 }
  0xed PF: > { %s15_s18 = sadd.s32 1, %s438_s18  }
  0xee   : > { %p12_p4 = scmp.ge.s32.totalorder %s15_s18, 4  }
  0xf0   :  { %14 = sbr.rel (!%p12_p4) target bundleno = 1 (0x1), region = 70 }

</bundles_post_ra>
